<compile_context>
chip_gen: v6e
topology: v6e:2x2x1
jax: 0.10.0
libtpu: 0.0.40
codegen_flags: <defaults>
</compile_context>

<pallas_src>
import math
import functools

import jax
import jax.numpy as jnp
from jax.experimental import pallas as pl
from jax.experimental.pallas import tpu as pltpu


def _round_up(x, m):
    return (x + m - 1) // m * m


def _pick_tile(dim_padded, max_tile, granule):
    """Largest multiple of `granule` that divides `dim_padded` and is <= max_tile."""
    t = min(max_tile, dim_padded)
    t = max((t // granule) * granule, granule)
    while dim_padded % t != 0:
        t -= granule
    return t


def _kp_linear_kernel(*refs, has_bias, precision):
    """One (tm, tn) output tile, K streamed along grid axis 2 (innermost)."""
    if has_bias:
        x_ref, w_ref, b_ref, o_ref = refs
    else:
        x_ref, w_ref, o_ref = refs
        b_ref = None

    k = pl.program_id(2)

    # Weight already laid out (K, N): lane-dense MXU RHS, no in-kernel transpose.
    part = jnp.dot(
        x_ref[...], w_ref[...],
        preferred_element_type=jnp.float32,
        precision=precision,
    )

    # Accumulate directly into the f32 output tile (resident across the K axis;
    # written back to HBM exactly once per (i, j)).
    @pl.when(k == 0)
    def _():
        o_ref[...] = part

    @pl.when(k > 0)
    def _():
        o_ref[...] += part

    if has_bias:
        @pl.when(k == pl.num_programs(2) - 1)
        def _():
            o_ref[...] += b_ref[...]          # (1, tn) broadcast over rows


def prepare_kp_linear_params(weight, bias=None, *, exact=False):
    """One-time weight/bias layout (hoist out of the per-call jitted path).

    weight: (out_features, in_features)  -- PyTorch layout.
    Returns:
      w_t : (Kp, Np) pre-transposed, zero-padded weight (bf16 unless exact)
      b2  : (1, Np) zero-padded f32 bias, or None
    """
    N, K = weight.shape
    Kp = _round_up(K, 128)
    Np = _round_up(N, 128)

    w_t = jnp.transpose(weight.astype(jnp.float32))           # (K, N)
    if (Kp != K) or (Np != N):
        w_t = jnp.pad(w_t, ((0, Kp - K), (0, Np - N)))
    if not exact:
        w_t = w_t.astype(jnp.bfloat16)

    b2 = None
    if bias is not None:
        b2 = bias.astype(jnp.float32).reshape(1, N)
        if Np != N:
            b2 = jnp.pad(b2, ((0, 0), (0, Np - N)))
    return w_t, b2


@functools.partial(jax.jit, static_argnames=("n_out", "tm_max", "tn_max", "tk_max"))
def kp_linear_prepared(x, w_t, b2=None, *, n_out,
                       tm_max=512, tn_max=1024, tk_max=512):
    """kpLinear forward with a pre-laid-out weight (from prepare_kp_linear_params)."""
    in_shape = x.shape
    K = in_shape[-1]
    Kp, Np = w_t.shape
    N = n_out
    assert Kp % 128 == 0 and Np % 128 == 0 and Kp >= K and Np >= N

    exact = (w_t.dtype == jnp.float32)
    precision = jax.lax.Precision.HIGHEST if exact else None

    x2 = x.reshape(-1, K).astype(w_t.dtype)
    M = x2.shape[0]

    # K is only padded when not 128-aligned (zero columns contribute nothing,
    # since the weight was zero-padded identically at prepare time).
    # TODO(synk): mask the K tail in-kernel instead of padding x for unaligned K.
    if Kp != K:
        x2 = jnp.pad(x2, ((0, 0), (0, Kp - K)))

    # ---- tile selection -------------------------------------------------------
    # Prefer 256-aligned N/K tiles (full 2x256x256 MXU passes on v6e/v7x).
    gran_n = 256 if Np % 256 == 0 else 128
    gran_k = 256 if Kp % 256 == 0 else 128
    tn = _pick_tile(Np, tn_max, gran_n)
    tk = _pick_tile(Kp, tk_max, gran_k)

    # M is never padded: either one full-dim row tile, or 8-aligned tiles with a
    # partial edge block (out-of-bounds rows are masked on write-back).
    tm_max = max(8, (tm_max // 8) * 8)
    tm = M if M <= tm_max else tm_max

    grid_m = pl.cdiv(M, tm)
    grid_n = Np // tn
    # v7x has 2 TensorCores: keep >= 2 parallel tiles when the shape allows.
    if grid_m == 1 and grid_n == 1 and Np >= 256:
        tn = _pick_tile(Np, Np // 2, 128)
        grid_n = Np // tn
    grid_k = Kp // tk
    grid = (grid_m, grid_n, grid_k)

    has_bias = b2 is not None
    kernel = functools.partial(_kp_linear_kernel,
                               has_bias=has_bias, precision=precision)

    in_specs = [
        pl.BlockSpec((tm, tk), lambda i, j, k: (i, k)),   # x row/K tile
        pl.BlockSpec((tk, tn), lambda i, j, k: (k, j)),   # streamed (Kp, Np) weight
    ]
    operands = [x2, w_t]
    if has_bias:
        in_specs.append(pl.BlockSpec((1, tn), lambda i, j, k: (0, j)))
        operands.append(b2)

    itemsize = jnp.dtype(w_t.dtype).itemsize
    cost = pl.CostEstimate(
        flops=2 * M * N * K,
        transcendentals=0,
        bytes_accessed=(M * Kp * itemsize * grid_n        # x re-read once per N tile
                        + Kp * Np * itemsize * grid_m     # weight re-read once per M tile
                        + (Np * 4 * grid_m if has_bias else 0)
                        + M * Np * 4),                    # output written once
    )

    out = pl.pallas_call(
        kernel,
        out_shape=jax.ShapeDtypeStruct((M, Np), jnp.float32),
        grid_spec=pltpu.PrefetchScalarGridSpec(
            num_scalar_prefetch=0,
            grid=grid,
            in_specs=in_specs,
            out_specs=pl.BlockSpec((tm, tn), lambda i, j, k: (i, j)),
        ),
        compiler_params=pltpu.CompilerParams(
            dimension_semantics=("parallel", "parallel", "arbitrary"),
        ),
        cost_estimate=cost,
    )(*operands)

    if Np != N:
        out = out[:, :N]
    return out.reshape(*in_shape[:-1], N)


def kp_linear(x, weight, bias=None, *, exact=False,
              tm_max=512, tn_max=1024, tk_max=512):
    """Convenience wrapper matching kpLinear.forward.

    Default path uses bf16 MXU inputs with f32 accumulation; pass exact=True for
    f32 inputs with precision=HIGHEST (faithful to the f32 PyTorch reference).
    For repeated calls, prefer prepare_kp_linear_params + kp_linear_prepared so
    the weight transpose/pad is done once instead of per call.
    """
    w_t, b2 = prepare_kp_linear_params(weight, bias, exact=exact)
    return kp_linear_prepared(x, w_t, b2, n_out=weight.shape[0],
                              tm_max=tm_max, tn_max=tn_max, tk_max=tk_max)


def init_kp_linear_params(key, in_features, out_features, use_bias=True):
    """Deterministic init matching nn.init.kaiming_uniform_(a=sqrt(5)) + bias bound."""
    kw, kb = jax.random.split(key)
    bound = 1.0 / math.sqrt(in_features)   # kaiming_uniform_(a=sqrt(5)) => 1/sqrt(fan_in)
    weight = jax.random.uniform(
        kw, (out_features, in_features), jnp.float32, -bound, bound)
    bias = None
    if use_bias:
        bias = jax.random.uniform(kb, (out_features,), jnp.float32, -bound, bound)
    return weight, bias


# TODO(synk): backward pass (kp_linear_backward / autograd) is not implemented;
# this script covers the forward kernel only.

if __name__ == "__main__":
    key = jax.random.PRNGKey(0)
    k_x, k_p = jax.random.split(key)

    batch, seq, in_features, out_features = 2, 8, 32, 48
    x = jax.random.normal(k_x, (batch, seq, in_features), jnp.float32)
    weight, bias = init_kp_linear_params(k_p, in_features, out_features, use_bias=True)

    ref = x.reshape(-1, in_features) @ weight.T + bias
    ref = ref.reshape(batch, seq, out_features)

    # Default path: bf16 MXU inputs, f32 accumulation.
    out = jax.block_until_ready(kp_linear(x, weight, bias))
    assert out.shape == (batch, seq, out_features)
    assert out.dtype == jnp.float32
    assert jnp.allclose(out, ref, atol=5e-2, rtol=5e-2)

    # Exact f32 path (precision=HIGHEST) matches the f32 reference tightly.
    out_exact = jax.block_until_ready(kp_linear(x, weight, bias, exact=True))
    assert jnp.allclose(out_exact, ref, atol=1e-5, rtol=1e-5)

    # bias=None path (bias-free kernel, no zero-bias DMA/add).
    out_nb = jax.block_until_ready(kp_linear(x, weight, None))
    ref_nb = (x.reshape(-1, in_features) @ weight.T).reshape(batch, seq, out_features)
    assert jnp.allclose(out_nb, ref_nb, atol=5e-2, rtol=5e-2)

    # Prepared-weight path (layout hoisted out of the per-call jitted path).
    w_t, b2 = prepare_kp_linear_params(weight, bias)
    out_prep = jax.block_until_ready(
        kp_linear_prepared(x, w_t, b2, n_out=out_features))
    assert jnp.allclose(out_prep, ref, atol=5e-2, rtol=5e-2)

    print("KERNEL_OK")
</pallas_src>

<mosaic_0001>
module attributes {stable_mosaic.version = 11 : i64} {
  func.func @_kp_linear_kernel(%arg0: i32, %arg1: i32, %arg2: i32, %arg3: memref<16x128xbf16, #tpu.memory_space<vmem>>, %arg4: memref<128x128xbf16, #tpu.memory_space<vmem>>, %arg5: memref<1x128xf32, #tpu.memory_space<vmem>>, %arg6: memref<16x128xf32, #tpu.memory_space<vmem>>) attributes {dimension_semantics = [#tpu.dimension_semantics<parallel>, #tpu.dimension_semantics<parallel>, #tpu.dimension_semantics<arbitrary>], iteration_bounds = array<i64: 1, 1, 1>, scalar_prefetch = 0 : i64, scratch_operands = 0 : i64, tpu.core_type = #tpu.core_type<tc>, window_params = [{transform_indices = @transform_0, window_bounds = array<i64: 16, 128>}, {transform_indices = @transform_1, window_bounds = array<i64: 128, 128>}, {transform_indices = @transform_2, window_bounds = array<i64: 1, 128>}, {transform_indices = @transform_3, window_bounds = array<i64: 16, 128>}]} {
    %c0 = arith.constant 0 : index
    %c0_0 = arith.constant 0 : index
    %0 = vector.load %arg3[%c0, %c0_0] : memref<16x128xbf16, #tpu.memory_space<vmem>>, vector<16x128xbf16>
    %c0_1 = arith.constant 0 : index
    %c0_2 = arith.constant 0 : index
    %1 = vector.load %arg4[%c0_1, %c0_2] : memref<128x128xbf16, #tpu.memory_space<vmem>>, vector<128x128xbf16>
    %cst = arith.constant dense<0.000000e+00> : vector<16x128xf32>
    %2 = tpu.matmul %0, %1, %cst {dimension_numbers = #tpu.dot_dimension_numbers<[1], [0], [0], [1], [0, 0, 1, 1], [], []>} : vector<16x128xbf16>, vector<128x128xbf16>, vector<16x128xf32> -> vector<16x128xf32>
    %c0_i32 = arith.constant 0 : i32
    %3 = arith.cmpi eq, %arg2, %c0_i32 : i32
    %4 = arith.extui %3 : i1 to i32
    %c0_i32_3 = arith.constant 0 : i32
    %5 = arith.cmpi ne, %4, %c0_i32_3 : i32
    scf.if %5 {
      %c0_8 = arith.constant 0 : index
      %c0_9 = arith.constant 0 : index
      %12 = vector.load %arg6[%c0_8, %c0_9] : memref<16x128xf32, #tpu.memory_space<vmem>>, vector<16x128xf32>
      tpu.vector_store %arg6[%c0_8, %c0_9], %2 {strides = array<i32>} : memref<16x128xf32, #tpu.memory_space<vmem>>, vector<16x128xf32>,
    } else {
    }
    %c0_i32_4 = arith.constant 0 : i32
    %6 = arith.cmpi sgt, %arg2, %c0_i32_4 : i32
    %7 = arith.extui %6 : i1 to i32
    %c0_i32_5 = arith.constant 0 : i32
    %8 = arith.cmpi ne, %7, %c0_i32_5 : i32
    scf.if %8 {
      %c0_8 = arith.constant 0 : index
      %c0_9 = arith.constant 0 : index
      %12 = vector.load %arg6[%c0_8, %c0_9] : memref<16x128xf32, #tpu.memory_space<vmem>>, vector<16x128xf32>
      %13 = arith.addf %12, %2 : vector<16x128xf32>
      %c0_10 = arith.constant 0 : index
      %c0_11 = arith.constant 0 : index
      %14 = vector.load %arg6[%c0_10, %c0_11] : memref<16x128xf32, #tpu.memory_space<vmem>>, vector<16x128xf32>
      tpu.vector_store %arg6[%c0_10, %c0_11], %13 {strides = array<i32>} : memref<16x128xf32, #tpu.memory_space<vmem>>, vector<16x128xf32>,
    } else {
    }
    %c0_i32_6 = arith.constant 0 : i32
    %9 = arith.cmpi eq, %arg2, %c0_i32_6 : i32
    %10 = arith.extui %9 : i1 to i32
    %c0_i32_7 = arith.constant 0 : i32
    %11 = arith.cmpi ne, %10, %c0_i32_7 : i32
    scf.if %11 {
      %c0_8 = arith.constant 0 : index
      %c0_9 = arith.constant 0 : index
      %12 = vector.load %arg6[%c0_8, %c0_9] : memref<16x128xf32, #tpu.memory_space<vmem>>, vector<16x128xf32>
      %c0_10 = arith.constant 0 : index
      %c0_11 = arith.constant 0 : index
      %13 = vector.load %arg5[%c0_10, %c0_11] : memref<1x128xf32, #tpu.memory_space<vmem>>, vector<1x128xf32>
      %14 = vector.broadcast %13 : vector<1x128xf32> to vector<16x128xf32>
      %15 = arith.addf %12, %14 : vector<16x128xf32>
      %c0_12 = arith.constant 0 : index
      %c0_13 = arith.constant 0 : index
      %16 = vector.load %arg6[%c0_12, %c0_13] : memref<16x128xf32, #tpu.memory_space<vmem>>, vector<16x128xf32>
      tpu.vector_store %arg6[%c0_12, %c0_13], %15 {strides = array<i32>} : memref<16x128xf32, #tpu.memory_space<vmem>>, vector<16x128xf32>,
    } else {
    }
    return
  }
  func.func @transform_0(%arg0: i32, %arg1: i32, %arg2: i32) -> (i32, i32) {
    %c0_i32 = arith.constant 0 : i32
    return %arg0, %arg2 : i32, i32
  }
  func.func @transform_1(%arg0: i32, %arg1: i32, %arg2: i32) -> (i32, i32) {
    %c0_i32 = arith.constant 0 : i32
    return %arg2, %arg1 : i32, i32
  }
  func.func @transform_2(%arg0: i32, %arg1: i32, %arg2: i32) -> (i32, i32) {
    %c0_i32 = arith.constant 0 : i32
    %c0_i32_0 = arith.constant 0 : i32
    return %c0_i32, %arg1 : i32, i32
  }
  func.func @transform_3(%arg0: i32, %arg1: i32, %arg2: i32) -> (i32, i32) {
    %c0_i32 = arith.constant 0 : i32
    return %arg0, %arg1 : i32, i32
  }
}

</mosaic_0001>

<bundles_post_ra>
// kernel: kp_linear_prepared.1
= control target key start
LH: loop header
LB: loop body
LE: loop exit
PB: predicated region body
PF: predicated region fallthrough
CT: control target
= control target key end

     0   :  { %8 = vsyncpa [#allocation3], 0  ;;  %s254_s12 = smov [#allocation2]   ;;  %s294_s0 = inlined_call_operand.vmem [shape: bf16[16,128], index: 0, kind: input, shape index: {}]   ;;  %s295_s1 = inlined_call_operand.hbm [shape: bf16[128,128], index: 1, kind: input, shape index: {}]   ;;  %s296_s2 = inlined_call_operand.vmem [shape: f32[1,128], index: 2, kind: input, shape index: {}]   ;;  %s297_s3 = inlined_call_operand.vmem [shape: f32[16,128], index: 3, kind: output, shape index: {}]  }
   0x1   :  { %s16_s13 = sshll.u32 %s254_s12, 4  ;;  %s17_s13 = int_to_ptr.vmem [resolvable:$true] %s16_s13 }
   0x2   :  { %s240_s14 = scalar_lea.vmem %s17_s13, 1024  ;;  %p245_p1 = scmp.lt.s32.totalorder %s17_s13, %s17_s13 }
   0x3   :  { %p241_p0 = scmp.ne.s32.totalorder %s17_s13, %s240_s14  ;;  %p246_p2 = scmp.lt.s32.totalorder %s240_s14, %s240_s14 }
   0x5   :  { %p247_p3 = por %p246_p2, %p245_p1 }
   0x7   :  { %p248_p4 = pnand %p247_p3, %p241_p0 }
   0x9   :  { %251 = shalt.err (!%p248_p4)
}
   0xa   :  { %s255_s15 = smov 64   ;;  %s256_s16 = smov 4  }
   0xb   :  { %22 = dma.hbm_to_vmem [thread:$0]  %s295_s1, 1024, %s17_s13, [#allocation3], %s255_s15, %s255_s15, %s256_s16  }
   0xc   :  { %252 = dma.done.wait [#allocation3], 1024  }
   0xd   :  { %253 = vsyncadd [#allocation3], 4294966272  ;;  %v257_v0 = vmov 0.0   ;;  %vm258_vm0 = vmmov 0   ;;  %v223_v1 = vld [vmem:[#allocation2 + $0x38] sm:$0xff]   ;;  %v224_v2 = vld [vmem:[#allocation2 + $0x30] sm:$0xff]  }
   0xe   :  { %198 = vmatprep.subr.bf16.mxu0 %v257_v0  ;;  %214 = vmatprep.mubr.msk.bf16.mxu0 %vm258_vm0, %v257_v0  ;;  %v225_v3 = vld [vmem:[#allocation2 + $0x28] sm:$0xff]   ;;  %v226_v4 = vld [vmem:[#allocation2 + $0x20] sm:$0xff]   ;;  %v227_v5 = vld [vmem:[#allocation2 + $0x18] sm:$0xff]  }
   0xf   :  { %199 = vmatpush3.bf16.msra.mxu0 %v223_v1  ;;  %v228_v6 = vld [vmem:[#allocation2 + $0x10] sm:$0xff]   ;;  %v229_v7 = vld [vmem:[#allocation2 + $0x8] sm:$0xff]   ;;  %v230_v8 = vld [vmem:[#allocation2] sm:$0xff]  }
  0x10   :  { %200 = vmatprep.subr.bf16.mxu0 %v257_v0  ;;  %v231_v9 = vld [vmem:[%s294_s0] sm:$0xff]  }
  0x11   :  { %v188_v10 = vld [vmem:[%s296_s2] ss:$0 sm:$0xff] }
  0x13   :  { %201 = vmatpush3.bf16.msra.mxu0 %v224_v2 }
  0x14   :  { %202 = vmatprep.subr.bf16.mxu0 %v257_v0 }
  0x17   :  { %203 = vmatpush3.bf16.msra.mxu0 %v225_v3 }
  0x18   :  { %204 = vmatprep.subr.bf16.mxu0 %v257_v0 }
  0x1b   :  { %205 = vmatpush3.bf16.msra.mxu0 %v226_v4 }
  0x1c   :  { %206 = vmatprep.subr.bf16.mxu0 %v257_v0 }
  0x1f   :  { %207 = vmatpush3.bf16.msra.mxu0 %v227_v5 }
  0x20   :  { %208 = vmatprep.subr.bf16.mxu0 %v257_v0 }
  0x23   :  { %209 = vmatpush3.bf16.msra.mxu0 %v228_v6 }
  0x24   :  { %210 = vmatprep.subr.bf16.mxu0 %v257_v0 }
  0x27   :  { %211 = vmatpush3.bf16.msra.mxu0 %v229_v7 }
  0x28   :  { %212 = vmatprep.subr.bf16.mxu0 %v257_v0 }
  0x2b   :  { %213 = vmatpush3.bf16.msra.mxu0 %v230_v8 }
  0x2e   :  { %215 = vmatmul.mubr.bf16.vlgmr.msra.gmra.mxu0 %v231_v9 }
  0xee   :  { %v135_v11 = vpop.f32.mrf.mxu0 }
  0xef   :  { %v170_v12 = vadd.f32 %v188_v10, %v135_v11 }
  0xf0   :  { %v216_v13 = vpop.f32.mrf.mxu0 }
  0xf1   :  { %172 = vst [vmem:[%s297_s3] sm:$0xff] %v170_v12 }
  0xf2   :  { %v138_v14 = vpop.f32.mrf.mxu0 }
  0xf3   :  { %v171_v15 = vadd.f32 %v188_v10, %v138_v14 }
  0xf4   :  { %v217_v16 = vpop.f32.mrf.mxu0 }
  0xf5   :  { %173 = vst [vmem:[%s297_s3 + $0x8] sm:$0xff] %v171_v15 }
  0xf6   :  { %178 = vsyncpa [#allocation3], 1 }

</bundles_post_ra>
